<compile_context>
chip_gen: v7x
topology: tpu7x:2x2x1
jax: 0.10.0
libtpu: 0.0.40
codegen_flags: <defaults>
</compile_context>

<pallas_src>
import functools

import jax
import jax.numpy as jnp
from jax.experimental import pallas as pl
from jax.experimental.pallas import tpu as pltpu

SCALE_LIFETIME = 10000.0

# Physics constants (the "generate" path in the reference module).
_ALPHA = 0.847
_BETA = 0.2061
_VDRIFT = 0.153812
_LIFETIME = 6000.0 / SCALE_LIFETIME

_LANES = 128
# 2048 * 128 * 4B = 1 MiB per channel per block; fused input (3 ch) + output,
# double buffered ~= 8 MiB -> under v5e's 16 MiB default scoped VMEM and well
# under v7x's 64 MiB physical VMEM.
_MAX_TILE_ROWS = 2048


def _round_up(a, b):
    return ((a + b - 1) // b) * b


def _cdiv(a, b):
    return (a + b - 1) // b


def _sim_ionization_kernel(params_ref, x_ref, q_ref):
    """Elementwise ionization model on a dense (3, tile_rows, 128) slab.

    params_ref: SMEM (3,) f32 = (alpha, beta, inv_tau)
                where inv_tau = -1 / (vdrift * lifetime * scale_lifetime)
    x_ref: VMEM (3, tile_rows, 128) f32, channels = (E, drift_x, dE/dx)
    q_ref: VMEM (tile_rows, 128) f32 output (Q only)
    """
    alpha = params_ref[0]
    beta = params_ref[1]
    inv_tau = params_ref[2]

    e = x_ref[0]
    xd = x_ref[1]
    dedx = x_ref[2]

    bd = beta * dedx
    # log -> EUP, exact reciprocal keeps the VALU divide tail short.
    q = e * jnp.log(alpha + bd) * pl.reciprocal(bd, approx=False)
    q_ref[...] = q * jnp.exp(xd * inv_tau)


@functools.partial(jax.jit, static_argnames=("tile_rows",))
def _sim_ionization_call(x3d, params, tile_rows):
    """x3d: (3, rows_pad, 128) f32 with rows_pad % tile_rows == 0.

    params: (3,) f32 = (alpha, beta, inv_tau).  Returns Q as (rows_pad, 128).
    """
    c, rows, lanes = x3d.shape
    grid = (rows // tile_rows,)
    n_elems = rows * lanes
    return pl.pallas_call(
        _sim_ionization_kernel,
        out_shape=jax.ShapeDtypeStruct((rows, lanes), jnp.float32),
        grid_spec=pltpu.PrefetchScalarGridSpec(
            num_scalar_prefetch=0,
            grid=grid,
            in_specs=[
                pl.BlockSpec(memory_space=pltpu.SMEM),           # params (3,)
                pl.BlockSpec((c, tile_rows, lanes),
                             lambda i: (0, i, 0)),                # fused slab
            ],
            out_specs=pl.BlockSpec((tile_rows, lanes), lambda i: (i, 0)),
        ),
        compiler_params=pltpu.CompilerParams(
            dimension_semantics=("parallel",),
            vmem_limit_bytes=32 * 1024 * 1024,
        ),
        cost_estimate=pl.CostEstimate(
            flops=5 * n_elems,
            transcendentals=2 * n_elems,
            bytes_accessed=16 * n_elems,
        ),
    )(params, x3d)


class SimIonization:
    """JAX/Pallas port of the PyTorch SimIonization module (forward only)."""

    def __init__(self, key, test_case=0, std_in=0.1):
        k = jax.random.split(key, 8)
        self.scale_lifetime = SCALE_LIFETIME
        # deterministic in-script "parameter" initialization mirroring __init__
        self._v_density = jax.random.normal(k[0], ())
        if test_case == 0:
            self._v_alpha = jnp.float32(_ALPHA)
            self._v_beta = jnp.float32(_BETA)
        elif test_case == 1:
            self._v_beta = jax.random.uniform(k[1], ())
            self._v_alpha = jax.random.uniform(k[2], ())
        else:
            self._v_alpha = _ALPHA + std_in * jax.random.normal(k[1], ())
            self._v_beta = _BETA + std_in * jax.random.normal(k[2], ())
        self._v_efield = jax.random.uniform(k[3], ())
        self._v_lifetime = _LIFETIME + std_in * jax.random.normal(k[4], ())
        self._v_energy_threshold = jax.random.uniform(k[5], ())
        self._v_dedx_threshold = jax.random.uniform(k[6], ())
        self._v_vdrift = jax.random.uniform(k[7], ())

    def _combine(self, x, alpha, beta, vdrift, lifetime):
        n, c = x.shape
        assert c == 3
        x = x.astype(jnp.float32)

        rows = _round_up(max(n, 1), _LANES) // _LANES

        # Adaptive tile selection: padding waste < 8 rows per tile.  When
        # rows >= 16 force an even number (>= 2) of grid steps so both v7x
        # TensorCores get work under dimension_semantics=("parallel",).
        num_tiles = _cdiv(rows, _MAX_TILE_ROWS)
        if rows >= 16:
            num_tiles = max(num_tiles, 2)
            num_tiles += num_tiles % 2
        tile_rows = _round_up(_cdiv(rows, num_tiles), 8)
        rows_pad = _round_up(rows, tile_rows)
        n_pad = rows_pad * _LANES

        # Single fused pad + transpose: (N, 3) row-major -> lane-dense
        # (3, rows_pad, 128) slab.  One HBM pass instead of three strided
        # column extractions.  Pad value 1.0 keeps log()/divide finite for the
        # physics constants; any NaN/Inf in discarded padded lanes is sliced
        # away below and never affects results.
        xt = jnp.pad(x, ((0, n_pad - n), (0, 0)), constant_values=1.0)
        xt = xt.T.reshape(3, rows_pad, _LANES)

        alpha = jnp.asarray(alpha, jnp.float32)
        beta = jnp.asarray(beta, jnp.float32)
        vdrift = jnp.asarray(vdrift, jnp.float32)
        lifetime = jnp.asarray(lifetime, jnp.float32)
        # Fold -1/vdrift/(lifetime*scale) into a single scalar: removes two
        # per-element divides inside the kernel.
        inv_tau = -1.0 / (vdrift * lifetime * jnp.float32(SCALE_LIFETIME))
        params = jnp.stack([alpha, beta, inv_tau])

        q2d = _sim_ionization_call(xt, params, tile_rows=tile_rows)

        # Re-interleave output from the already-dense padded slabs (no second
        # strided read of the original x).
        q = q2d.reshape(-1)[:n]
        x1 = xt[1].reshape(-1)[:n]
        x2 = xt[2].reshape(-1)[:n]
        return jnp.stack([q, x1, x2], axis=1)

    def forward(self, x, task):
        if task == "generate":
            return self._combine(x, _ALPHA, _BETA, _VDRIFT, _LIFETIME)
        elif task == "learn":
            return self._combine(x, self._v_alpha, self._v_beta,
                                 self._v_vdrift, self._v_lifetime)
        else:
            raise ValueError(f"Task {task} is invalid")

    __call__ = forward


def _reference(x, alpha, beta, vdrift, lifetime):
    bd = beta * x[:, 2]
    q = x[:, 0] * jnp.log(alpha + bd) / bd
    q = q * jnp.exp(-1.0 * x[:, 1] / vdrift / (lifetime * SCALE_LIFETIME))
    return jnp.stack([q, x[:, 1], x[:, 2]], axis=1)


def _make_input(key, n):
    k_e, k_x, k_d = jax.random.split(key, 3)
    # (E, drift_x, dE/dx): keep dE/dx strictly positive like real physics input
    e = jax.random.uniform(k_e, (n,), minval=0.1, maxval=5.0)
    xd = jax.random.uniform(k_x, (n,), minval=0.0, maxval=100.0)
    dedx = jax.random.uniform(k_d, (n,), minval=0.5, maxval=4.0)
    return jnp.stack([e, xd, dedx], axis=1).astype(jnp.float32)   # (N, 3)


if __name__ == "__main__":
    key = jax.random.PRNGKey(0)
    k_mod, k_small, k_mid, k_big = jax.random.split(key, 4)

    model = SimIonization(k_mod, test_case=0)

    # Small primary check, a ragged-N check, and a multi-grid-step check.
    for k_in, n in ((k_small, 64), (k_mid, 3000), (k_big, 50_000)):
        x = _make_input(k_in, n)

        out_gen = jax.block_until_ready(model(x, "generate"))
        out_learn = jax.block_until_ready(model(x, "learn"))

        ref_gen = _reference(x, _ALPHA, _BETA, _VDRIFT, _LIFETIME)
        ref_learn = _reference(x, model._v_alpha, model._v_beta,
                               model._v_vdrift, model._v_lifetime)

        assert out_gen.shape == (n, 3) and out_learn.shape == (n, 3)
        assert jnp.allclose(out_gen, ref_gen, rtol=1e-5, atol=1e-5)
        assert jnp.allclose(out_learn, ref_learn, rtol=1e-5, atol=1e-5)

    print("KERNEL_OK")
</pallas_src>

<mosaic_0001>
module attributes {stable_mosaic.version = 11 : i64} {
  func.func @_sim_ionization_kernel(%arg0: i32, %arg1: memref<3xf32, #tpu.memory_space<smem>>, %arg2: memref<3x8x128xf32, #tpu.memory_space<vmem>>, %arg3: memref<8x128xf32, #tpu.memory_space<vmem>>) attributes {dimension_semantics = [#tpu.dimension_semantics<parallel>], iteration_bounds = array<i64: 1>, scalar_prefetch = 0 : i64, scratch_operands = 0 : i64, tpu.core_type = #tpu.core_type<tc>, window_params = [{transform_indices = @transform_0, window_bounds = array<i64: 3>}, {transform_indices = @transform_1, window_bounds = array<i64: 3, 8, 128>}, {transform_indices = @transform_2, window_bounds = array<i64: 8, 128>}]} {
    %c0 = arith.constant 0 : index
    %0 = memref.load %arg1[%c0] : memref<3xf32, #tpu.memory_space<smem>>
    %c1 = arith.constant 1 : index
    %1 = memref.load %arg1[%c1] : memref<3xf32, #tpu.memory_space<smem>>
    %c2 = arith.constant 2 : index
    %2 = memref.load %arg1[%c2] : memref<3xf32, #tpu.memory_space<smem>>
    %c0_0 = arith.constant 0 : index
    %c0_1 = arith.constant 0 : index
    %c0_2 = arith.constant 0 : index
    %3 = vector.load %arg2[%c0_0, %c0_1, %c0_2] : memref<3x8x128xf32, #tpu.memory_space<vmem>>, vector<1x8x128xf32>
    %4 = vector.shape_cast %3 : vector<1x8x128xf32> to vector<8x128xf32>
    %c1_3 = arith.constant 1 : index
    %c0_4 = arith.constant 0 : index
    %c0_5 = arith.constant 0 : index
    %5 = vector.load %arg2[%c1_3, %c0_4, %c0_5] : memref<3x8x128xf32, #tpu.memory_space<vmem>>, vector<1x8x128xf32>
    %6 = vector.shape_cast %5 : vector<1x8x128xf32> to vector<8x128xf32>
    %c2_6 = arith.constant 2 : index
    %c0_7 = arith.constant 0 : index
    %c0_8 = arith.constant 0 : index
    %7 = vector.load %arg2[%c2_6, %c0_7, %c0_8] : memref<3x8x128xf32, #tpu.memory_space<vmem>>, vector<1x8x128xf32>
    %8 = vector.shape_cast %7 : vector<1x8x128xf32> to vector<8x128xf32>
    %9 = vector.broadcast %1 : f32 to vector<8x128xf32>
    %10 = arith.mulf %9, %8 : vector<8x128xf32>
    %11 = vector.broadcast %0 : f32 to vector<8x128xf32>
    %12 = arith.addf %11, %10 : vector<8x128xf32>
    %13 = math.log %12 : vector<8x128xf32>
    %14 = arith.mulf %4, %13 : vector<8x128xf32>
    %15 = tpu.reciprocal %10 : vector<8x128xf32> -> vector<8x128xf32>
    %16 = arith.mulf %14, %15 : vector<8x128xf32>
    %17 = vector.broadcast %2 : f32 to vector<8x128xf32>
    %18 = arith.mulf %6, %17 : vector<8x128xf32>
    %19 = math.exp %18 : vector<8x128xf32>
    %20 = arith.mulf %16, %19 : vector<8x128xf32>
    %c0_9 = arith.constant 0 : index
    %c0_10 = arith.constant 0 : index
    %21 = vector.load %arg3[%c0_9, %c0_10] : memref<8x128xf32, #tpu.memory_space<vmem>>, vector<8x128xf32>
    tpu.vector_store %arg3[%c0_9, %c0_10], %20 {strides = array<i32>} : memref<8x128xf32, #tpu.memory_space<vmem>>, vector<8x128xf32>,
    return
  }
  func.func @transform_0(%arg0: i32) -> i32 {
    %c0_i32 = arith.constant 0 : i32
    %c0_i32_0 = arith.constant 0 : i32
    return %c0_i32 : i32
  }
  func.func @transform_1(%arg0: i32) -> (i32, i32, i32) {
    %c0_i32 = arith.constant 0 : i32
    %c0_i32_0 = arith.constant 0 : i32
    %c0_i32_1 = arith.constant 0 : i32
    return %c0_i32, %arg0, %c0_i32_0 : i32, i32, i32
  }
  func.func @transform_2(%arg0: i32) -> (i32, i32) {
    %c0_i32 = arith.constant 0 : i32
    %c0_i32_0 = arith.constant 0 : i32
    return %arg0, %c0_i32 : i32, i32
  }
}

</mosaic_0001>

<bundles_post_ra>
// kernel: _sim_ionization_call.1
= control target key start
LH: loop header
LB: loop body
LE: loop exit
PB: predicated region body
PF: predicated region fallthrough
CT: control target
= control target key end

     0   :  { %7 = vsyncpa [#allocation5], 0  ;;  %s200_s0 = inlined_call_operand.vmem [shape: f32[3], index: 0, kind: input, shape index: {}]   ;;  %s201_s1 = inlined_call_operand.hbm [shape: f32[3,8,128], index: 1, kind: input, shape index: {}]   ;;  %s202_s2 = inlined_call_operand.hbm [shape: f32[8,128], index: 2, kind: output, shape index: {}]  }
   0x1   :  { %8 = vsyncpa [#allocation3], 0 }
   0x2   :  { %9 = vsyncpa [#allocation4], 0  ;;  %s16_s11 = sshll.u32 %s200_s0, 4  ;;  %s17_s11 = int_to_ptr.vmem [resolvable:$true] %s16_s11 }
   0x3   :  { %s91_s12 = scalar_lea.vmem %s17_s11, 16  ;;  %p96_p1 = scmp.lt.s32.totalorder %s17_s11, %s17_s11 }
   0x4   :  { %p92_p0 = scmp.ne.s32.totalorder %s17_s11, %s91_s12  ;;  %p97_p2 = scmp.lt.s32.totalorder %s91_s12, %s91_s12 }
   0x6   :  { %p98_p3 = por %p97_p2, %p96_p1 }
   0x8   :  { %p99_p4 = pnand %p98_p3, %p92_p0 }
   0xa   :  { %102 = shalt.err (!%p99_p4)
}
   0xb   :  { %s153_s13 = smov [#allocation2]   ;;  %s154_s14 = smov [#allocation6]  }
   0xc   :  { %19 = dma.vmem_to_smem %s17_s11, 16, %s153_s13, [#allocation5]  }
   0xd   :  { %s25_s15 = sshll.u32 %s154_s14, 4  ;;  %s103_s18 = scalar_lea.hbm %s201_s1, 384  ;;  %s26_s15 = int_to_ptr.vmem [resolvable:$true] %s25_s15 }
   0xe   :  { %p104_p5 = scmp.ne.s32.totalorder %s201_s1, %s103_s18  ;;  %p107_p6 = scmp.lt.u32.totalorder %s103_s18, %s201_s1 }
  0x10   :  { %p109_p7 = pnand %p107_p6, %p104_p5 }
  0x12   :  { %112 = shalt.err (!%p109_p7)
}
  0x13   :  { %s113_s22 = scalar_lea.vmem %s26_s15, 384  ;;  %p118_p9 = scmp.lt.s32.totalorder %s26_s15, %s26_s15 }
  0x14   :  { %p114_p8 = scmp.ne.s32.totalorder %s26_s15, %s113_s22  ;;  %p119_p10 = scmp.lt.s32.totalorder %s113_s22, %s113_s22 }
  0x16   :  { %p120_p11 = por %p119_p10, %p118_p9 }
  0x18   :  { %p121_p12 = pnand %p120_p11, %p114_p8 }
  0x1a   :  { %124 = shalt.err (!%p121_p12)
}
  0x1b   :  { %s155_s23 = smov 128   ;;  %s156_s24 = smov 8  }
  0x1c   :  { %31 = dma.hbm_to_vmem [thread:$0]  %s201_s1, 384, %s26_s15, [#allocation3], %s155_s23, %s155_s23, %s156_s24  }
  0x1d   :  { %147 = dma.done.wait [#allocation5], 16  }
  0x1e   :  { %148 = vsyncadd [#allocation5], 4294967280 }
  0x1f   :  { %149 = dma.done.wait [#allocation3], 384  }
  0x20   :  { %150 = vsyncadd [#allocation3], 4294966912 }
  0x21   :  { %38 = sfence }
  0x22   :  { %s39_s27 = sld [smem:[#allocation2]]  ;;  %s78_s28 = sld [smem:[#allocation2 + $0x1]]  ;;  %v46_v0 = vld [vmem:[#allocation6 + $0x10] sm:$0xff]  ;;  %v44_v1 = vld [vmem:[#allocation6 + $0x8] sm:$0xff]  ;;  %v42_v10 = vld [vmem:[#allocation6] sm:$0xff] }
  0x23   :  { %s79_s29 = sld [smem:[#allocation2 + $0x2]]  ;;  %s157_s1 = smov [#allocation7]  }
  0x24   :  { %s68_s30 = sshll.u32 %s157_s1, 4  ;;  %s69_s30 = int_to_ptr.vmem [resolvable:$true] %s68_s30 }
  0x25   :  { %s125_s3 = scalar_lea.vmem %s69_s30, 128  ;;  %p130_p0 = scmp.lt.s32.totalorder %s69_s30, %s69_s30 }
  0x26   :  { %p126_p13 = scmp.ne.s32.totalorder %s69_s30, %s125_s3  ;;  %p131_p1 = scmp.lt.s32.totalorder %s125_s3, %s125_s3 }
  0x28   :  { %v47_v2 = vstv %s78_s28  ;;  %v49_v3 = vstv %s39_s27  ;;  %p132_p2 = por %p131_p1, %p130_p0 }
  0x29   :  { %v48_v4 = vmul.f32 %v47_v2, %v46_v0  ;;  %v56_v5 = vstv %s79_s29 }
  0x2a   :  { %v57_v6 = vmul.f32 %v56_v5, %v44_v1  ;;  %p133_p3 = pnand %p132_p2, %p126_p13 }
  0x2b   :  { %v50_v7 = vadd.f32 %v49_v3, %v48_v4 }
  0x2c   :  { %v58_v8 = vmul.f32 1.442695, %v57_v6 }
  0x2d   :  { %85 = vlog2.f32 %v50_v7 }
  0x2e   :  { %87 = vrcp.f32 %v48_v4 }
  0x2f   :  { %89 = vpow2.f32 %v58_v8 }
  0x37   :  { %v86_v9 = vpop.eup %85 }
  0x38   :  { %v52_v11 = vmul.f32 0.6931472, %v86_v9  ;;  %v88_v12 = vpop.eup %87 }
  0x39   :  { %v90_v14 = vpop.eup %89 }
  0x3a   :  { %v53_v13 = vmul.f32 %v52_v11, %v42_v10 }
  0x3c   :  { %v55_v15 = vmul.f32 %v88_v12, %v53_v13 }
  0x3e   :  { %v60_v16 = vmul.f32 %v90_v14, %v55_v15 }
  0x40   :  { %61 = vst [vmem:[#allocation7] sm:$0xff] %v60_v16 }
  0x41   :  { %136 = shalt.err (!%p133_p3)
}
  0x42   :  { %s137_s6 = scalar_lea.hbm %s202_s2, 128 }
  0x43   :  { %p138_p4 = scmp.ne.s32.totalorder %s202_s2, %s137_s6  ;;  %p141_p5 = scmp.lt.u32.totalorder %s137_s6, %s202_s2 }
  0x45   :  { %p143_p6 = pnand %p141_p5, %p138_p4 }
  0x47   :  { %146 = shalt.err (!%p143_p6)
}
  0x48   :  { %71 = dma.vmem_to_hbm [thread:$0]  %s69_s30, 128, %s202_s2, [#allocation4]  }
  0x49   :  { %151 = dma.done.wait [#allocation4], 128  }
  0x4a   :  { %152 = vsyncadd [#allocation4], 4294967168 }
  0x4b   :  { %75 = vsyncpa [#allocation3], 1 }
  0x4c   :  { %76 = vsyncpa [#allocation4], 1 }
  0x4d   :  { %77 = vsyncpa [#allocation5], 1 }

</bundles_post_ra>
